<compile_context>
chip_gen: v7x
topology: tpu7x:2x2x1
jax: 0.10.0
libtpu: 0.0.40
codegen_flags: <defaults>
</compile_context>

<pallas_src>
import math

import jax
import jax.numpy as jnp
from jax.experimental import pallas as pl
from jax.experimental.pallas import tpu as pltpu


def _sparsemax_kernel(x_ref, o_ref, z_ref):
    """Sparsemax over axis 0 (sublanes) of a lane-dense (N, TR) tile.

    x_ref / o_ref : (N, TR) input / output tile (rows on lanes).
    z_ref         : (N, TR) f32 VMEM scratch holding the shifted logits so the
                    per-j row read is a cheap single-row vld followed by a
                    sublane broadcast (no cross-lane XLU traffic).
    """
    n = x_ref.shape[0]
    x = x_ref[...].astype(jnp.float32)
    # Shift by the per-row max (matches the torch.max subtraction).
    z = x - jnp.max(x, axis=0, keepdims=True)
    z_ref[...] = z

    zero = jnp.zeros_like(z)
    one = jnp.float32(1.0)

    # Sort-free formulation of the sorted-prefix test. For each element i the
    # sorted-domain test "1 + rank*z > cumsum" is identical for all tied
    # values, so per-element rank / partial-sum reproduce torch.sort + cumsum.
    def step(j, rank, ge_sum):
        zj = z_ref[pl.ds(j, 1), :]                 # (1, TR) row j
        ge = zj >= z                               # broadcasts over sublanes
        rank = rank + jnp.where(ge, 1.0, 0.0)
        ge_sum = ge_sum + jnp.where(ge, zj, 0.0)
        return rank, ge_sum

    if n <= 64:
        # Small N: static unroll (the common case here, N = 16).
        rank, ge_sum = zero, zero
        for j in range(n):
            rank, ge_sum = step(j, rank, ge_sum)
    else:
        # Wide logits axis: bound code size / vreg pressure with a real loop.
        # TODO(synk): for very wide N a sort-based formulation beats this
        # O(N^2) sort-free form.
        def body(j, carry):
            return step(j, *carry)

        rank, ge_sum = jax.lax.fori_loop(0, n, body, (zero, zero))

    is_gt = (one + rank * z) > ge_sum                                  # support mask
    k = jnp.max(jnp.where(is_gt, rank, 0.0), axis=0, keepdims=True)    # support size
    support_sum = jnp.sum(jnp.where(is_gt, z, 0.0), axis=0, keepdims=True)
    tau = (support_sum - one) / k
    o_ref[...] = jnp.maximum(z - tau, 0.0).astype(o_ref.dtype)


def _choose_row_tile(rows, row_tile):
    """Pick (tile, padded_rows) for the lane (row) axis.

    Prefers a lane-aligned tile that divides `rows` exactly so no HBM
    pad + slice round-trip is needed; a single full-extent block is used for
    small row counts.
    """
    row_tile = max(128, (row_tile // 128) * 128)
    if rows <= row_tile:
        return rows, rows                       # one block == full extent
    for tr in range(row_tile, 127, -128):       # lane-aligned exact divisor
        if rows % tr == 0:
            return tr, rows
    rows_pad = pl.cdiv(rows, row_tile) * row_tile
    return row_tile, rows_pad


def sparsemax(x, dim=-1, row_tile=512):
    """Sparsemax along `dim`, computed in a Pallas TPU kernel."""
    dim = dim % x.ndim
    # Move the sparsemax axis last, flatten everything else into rows.
    perm = tuple(i for i in range(x.ndim) if i != dim) + (dim,)
    inv_perm = tuple(perm.index(i) for i in range(x.ndim))
    xt = jnp.transpose(x, perm)                 # identity (free) when dim == -1
    moved_shape = xt.shape
    n = moved_shape[-1]
    rows = math.prod(moved_shape[:-1])
    x2d = xt.reshape(rows, n)                   # free reshape

    tr, rows_pad = _choose_row_tile(rows, row_tile)

    # Lane-dense compute layout: logits on sublanes, rows on lanes.
    xT = x2d.T                                  # (n, rows)
    if rows_pad != rows:
        xT = jnp.pad(xT, ((0, 0), (0, rows_pad - rows)))

    outT = pl.pallas_call(
        _sparsemax_kernel,
        out_shape=jax.ShapeDtypeStruct((n, rows_pad), x.dtype),
        grid_spec=pltpu.PrefetchScalarGridSpec(
            num_scalar_prefetch=0,
            grid=(rows_pad // tr,),
            in_specs=[pl.BlockSpec((n, tr), lambda i: (0, i))],
            out_specs=pl.BlockSpec((n, tr), lambda i: (0, i)),
            scratch_shapes=[pltpu.VMEM((n, tr), jnp.float32)],
        ),
        compiler_params=pltpu.CompilerParams(
            dimension_semantics=("parallel",),
        ),
    )(xT)

    if rows_pad != rows:
        outT = outT[:, :rows]
    out2d = outT.T
    return jnp.transpose(out2d.reshape(moved_shape), inv_perm)


def _sparsemax_ref(x, dim=-1):
    """Pure-JAX reference mirroring the PyTorch sort-based implementation."""
    x = jnp.moveaxis(x, dim, -1).astype(jnp.float32)
    z = x - jnp.max(x, axis=-1, keepdims=True)
    zs = -jnp.sort(-z, axis=-1)                       # descending sort
    n = z.shape[-1]
    rng = jnp.arange(1, n + 1, dtype=z.dtype)
    bound = 1.0 + rng * zs
    cumsum = jnp.cumsum(zs, axis=-1)
    is_gt = (bound > cumsum).astype(z.dtype)
    k = jnp.max(is_gt * rng, axis=-1, keepdims=True)
    tau = (jnp.sum(is_gt * zs, axis=-1, keepdims=True) - 1.0) / k
    out = jnp.maximum(z - tau, 0.0)
    return jnp.moveaxis(out, -1, dim)


if __name__ == "__main__":
    key = jax.random.PRNGKey(0)

    # 1) LGNN-style input, sparsemax over the last axis (rows=128, n=16).
    x = jax.random.normal(key, (2, 4, 16, 16), dtype=jnp.float32)
    out = jax.block_until_ready(sparsemax(x, dim=-1))
    ref = _sparsemax_ref(x, dim=-1)
    assert out.shape == x.shape and out.dtype == x.dtype
    assert jnp.allclose(jnp.sum(out, axis=-1), 1.0, atol=1e-5)
    assert jnp.allclose(out, ref, atol=1e-5, rtol=1e-5)

    # 2) Larger row count: exercises the multi-tile grid (rows=1024 -> 2 blocks).
    k2 = jax.random.PRNGKey(1)
    x2 = jax.random.normal(k2, (4, 8, 32, 16), dtype=jnp.float32)
    out2 = jax.block_until_ready(sparsemax(x2, dim=-1))
    ref2 = _sparsemax_ref(x2, dim=-1)
    assert jnp.allclose(out2, ref2, atol=1e-5, rtol=1e-5)

    # 3) Tie handling at the support boundary (repeated max values).
    x3 = jnp.tile(
        jnp.array([[2.0, 2.0, 1.0, 2.0, 0.5, -1.0, 2.0, 0.0]], dtype=jnp.float32),
        (8, 1),
    )
    out3 = jax.block_until_ready(sparsemax(x3, dim=-1))
    ref3 = _sparsemax_ref(x3, dim=-1)
    assert jnp.allclose(out3, ref3, atol=1e-5, rtol=1e-5)

    print("KERNEL_OK")
</pallas_src>

<mosaic_0001>
module attributes {stable_mosaic.version = 11 : i64} {
  func.func @_sparsemax_kernel(%arg0: i32, %arg1: memref<16x128xf32, #tpu.memory_space<vmem>>, %arg2: memref<16x128xf32, #tpu.memory_space<vmem>>, %arg3: memref<16x128xf32, #tpu.memory_space<vmem>>) attributes {dimension_semantics = [#tpu.dimension_semantics<parallel>], iteration_bounds = array<i64: 1>, scalar_prefetch = 0 : i64, scratch_operands = 1 : i64, tpu.core_type = #tpu.core_type<tc>, window_params = [{transform_indices = @transform_0, window_bounds = array<i64: 16, 128>}, {transform_indices = @transform_1, window_bounds = array<i64: 16, 128>}]} {
    %c0 = arith.constant 0 : index
    %c0_0 = arith.constant 0 : index
    %0 = vector.load %arg1[%c0, %c0_0] : memref<16x128xf32, #tpu.memory_space<vmem>>, vector<16x128xf32>
    %cst = arith.constant dense<0xFF800000> : vector<128xf32>
    %1 = vector.multi_reduction <maximumf>, %0, %cst [0] : vector<16x128xf32> to vector<128xf32>
    %2 = vector.shape_cast %1 : vector<128xf32> to vector<1x128xf32>
    %3 = vector.broadcast %2 : vector<1x128xf32> to vector<16x128xf32>
    %4 = arith.subf %0, %3 : vector<16x128xf32>
    %c0_1 = arith.constant 0 : index
    %c0_2 = arith.constant 0 : index
    %5 = vector.load %arg3[%c0_1, %c0_2] : memref<16x128xf32, #tpu.memory_space<vmem>>, vector<16x128xf32>
    tpu.vector_store %arg3[%c0_1, %c0_2], %4 {strides = array<i32>} : memref<16x128xf32, #tpu.memory_space<vmem>>, vector<16x128xf32>,
    %cst_3 = arith.constant 0.000000e+00 : f32
    %6 = vector.broadcast %cst_3 : f32 to vector<16x128xf32>
    %c0_4 = arith.constant 0 : index
    %c0_5 = arith.constant 0 : index
    %7 = vector.load %arg3[%c0_4, %c0_5] : memref<16x128xf32, #tpu.memory_space<vmem>>, vector<1x128xf32>
    %8 = vector.broadcast %7 : vector<1x128xf32> to vector<16x128xf32>
    %9 = arith.cmpf oge, %8, %4 : vector<16x128xf32>
    %cst_6 = arith.constant 1.000000e+00 : f32
    %cst_7 = arith.constant 0.000000e+00 : f32
    %10 = vector.broadcast %cst_6 : f32 to vector<16x128xf32>
    %11 = vector.broadcast %cst_7 : f32 to vector<16x128xf32>
    %12 = arith.select %9, %10, %11 : vector<16x128xi1>, vector<16x128xf32>
    %13 = arith.addf %6, %12 : vector<16x128xf32>
    %cst_8 = arith.constant 0.000000e+00 : f32
    %14 = vector.shape_cast %7 : vector<1x128xf32> to vector<1x128xf32>
    %15 = vector.broadcast %14 : vector<1x128xf32> to vector<16x128xf32>
    %16 = vector.broadcast %cst_8 : f32 to vector<16x128xf32>
    %17 = arith.select %9, %15, %16 : vector<16x128xi1>, vector<16x128xf32>
    %18 = arith.addf %6, %17 : vector<16x128xf32>
    %c1 = arith.constant 1 : index
    %c0_9 = arith.constant 0 : index
    %19 = vector.load %arg3[%c1, %c0_9] : memref<16x128xf32, #tpu.memory_space<vmem>>, vector<1x128xf32>
    %20 = vector.broadcast %19 : vector<1x128xf32> to vector<16x128xf32>
    %21 = arith.cmpf oge, %20, %4 : vector<16x128xf32>
    %cst_10 = arith.constant 1.000000e+00 : f32
    %cst_11 = arith.constant 0.000000e+00 : f32
    %22 = vector.broadcast %cst_10 : f32 to vector<16x128xf32>
    %23 = vector.broadcast %cst_11 : f32 to vector<16x128xf32>
    %24 = arith.select %21, %22, %23 : vector<16x128xi1>, vector<16x128xf32>
    %25 = arith.addf %13, %24 : vector<16x128xf32>
    %cst_12 = arith.constant 0.000000e+00 : f32
    %26 = vector.shape_cast %19 : vector<1x128xf32> to vector<1x128xf32>
    %27 = vector.broadcast %26 : vector<1x128xf32> to vector<16x128xf32>
    %28 = vector.broadcast %cst_12 : f32 to vector<16x128xf32>
    %29 = arith.select %21, %27, %28 : vector<16x128xi1>, vector<16x128xf32>
    %30 = arith.addf %18, %29 : vector<16x128xf32>
    %c2 = arith.constant 2 : index
    %c0_13 = arith.constant 0 : index
    %31 = vector.load %arg3[%c2, %c0_13] : memref<16x128xf32, #tpu.memory_space<vmem>>, vector<1x128xf32>
    %32 = vector.broadcast %31 : vector<1x128xf32> to vector<16x128xf32>
    %33 = arith.cmpf oge, %32, %4 : vector<16x128xf32>
    %cst_14 = arith.constant 1.000000e+00 : f32
    %cst_15 = arith.constant 0.000000e+00 : f32
    %34 = vector.broadcast %cst_14 : f32 to vector<16x128xf32>
    %35 = vector.broadcast %cst_15 : f32 to vector<16x128xf32>
    %36 = arith.select %33, %34, %35 : vector<16x128xi1>, vector<16x128xf32>
    %37 = arith.addf %25, %36 : vector<16x128xf32>
    %cst_16 = arith.constant 0.000000e+00 : f32
    %38 = vector.shape_cast %31 : vector<1x128xf32> to vector<1x128xf32>
    %39 = vector.broadcast %38 : vector<1x128xf32> to vector<16x128xf32>
    %40 = vector.broadcast %cst_16 : f32 to vector<16x128xf32>
    %41 = arith.select %33, %39, %40 : vector<16x128xi1>, vector<16x128xf32>
    %42 = arith.addf %30, %41 : vector<16x128xf32>
    %c3 = arith.constant 3 : index
    %c0_17 = arith.constant 0 : index
    %43 = vector.load %arg3[%c3, %c0_17] : memref<16x128xf32, #tpu.memory_space<vmem>>, vector<1x128xf32>
    %44 = vector.broadcast %43 : vector<1x128xf32> to vector<16x128xf32>
    %45 = arith.cmpf oge, %44, %4 : vector<16x128xf32>
    %cst_18 = arith.constant 1.000000e+00 : f32
    %cst_19 = arith.constant 0.000000e+00 : f32
    %46 = vector.broadcast %cst_18 : f32 to vector<16x128xf32>
    %47 = vector.broadcast %cst_19 : f32 to vector<16x128xf32>
    %48 = arith.select %45, %46, %47 : vector<16x128xi1>, vector<16x128xf32>
    %49 = arith.addf %37, %48 : vector<16x128xf32>
    %cst_20 = arith.constant 0.000000e+00 : f32
    %50 = vector.shape_cast %43 : vector<1x128xf32> to vector<1x128xf32>
    %51 = vector.broadcast %50 : vector<1x128xf32> to vector<16x128xf32>
    %52 = vector.broadcast %cst_20 : f32 to vector<16x128xf32>
    %53 = arith.select %45, %51, %52 : vector<16x128xi1>, vector<16x128xf32>
    %54 = arith.addf %42, %53 : vector<16x128xf32>
    %c4 = arith.constant 4 : index
    %c0_21 = arith.constant 0 : index
    %55 = vector.load %arg3[%c4, %c0_21] : memref<16x128xf32, #tpu.memory_space<vmem>>, vector<1x128xf32>
    %56 = vector.broadcast %55 : vector<1x128xf32> to vector<16x128xf32>
    %57 = arith.cmpf oge, %56, %4 : vector<16x128xf32>
    %cst_22 = arith.constant 1.000000e+00 : f32
    %cst_23 = arith.constant 0.000000e+00 : f32
    %58 = vector.broadcast %cst_22 : f32 to vector<16x128xf32>
    %59 = vector.broadcast %cst_23 : f32 to vector<16x128xf32>
    %60 = arith.select %57, %58, %59 : vector<16x128xi1>, vector<16x128xf32>
    %61 = arith.addf %49, %60 : vector<16x128xf32>
    %cst_24 = arith.constant 0.000000e+00 : f32
    %62 = vector.shape_cast %55 : vector<1x128xf32> to vector<1x128xf32>
    %63 = vector.broadcast %62 : vector<1x128xf32> to vector<16x128xf32>
    %64 = vector.broadcast %cst_24 : f32 to vector<16x128xf32>
    %65 = arith.select %57, %63, %64 : vector<16x128xi1>, vector<16x128xf32>
    %66 = arith.addf %54, %65 : vector<16x128xf32>
    %c5 = arith.constant 5 : index
    %c0_25 = arith.constant 0 : index
    %67 = vector.load %arg3[%c5, %c0_25] : memref<16x128xf32, #tpu.memory_space<vmem>>, vector<1x128xf32>
    %68 = vector.broadcast %67 : vector<1x128xf32> to vector<16x128xf32>
    %69 = arith.cmpf oge, %68, %4 : vector<16x128xf32>
    %cst_26 = arith.constant 1.000000e+00 : f32
    %cst_27 = arith.constant 0.000000e+00 : f32
    %70 = vector.broadcast %cst_26 : f32 to vector<16x128xf32>
    %71 = vector.broadcast %cst_27 : f32 to vector<16x128xf32>
    %72 = arith.select %69, %70, %71 : vector<16x128xi1>, vector<16x128xf32>
    %73 = arith.addf %61, %72 : vector<16x128xf32>
    %cst_28 = arith.constant 0.000000e+00 : f32
    %74 = vector.shape_cast %67 : vector<1x128xf32> to vector<1x128xf32>
    %75 = vector.broadcast %74 : vector<1x128xf32> to vector<16x128xf32>
    %76 = vector.broadcast %cst_28 : f32 to vector<16x128xf32>
    %77 = arith.select %69, %75, %76 : vector<16x128xi1>, vector<16x128xf32>
    %78 = arith.addf %66, %77 : vector<16x128xf32>
    %c6 = arith.constant 6 : index
    %c0_29 = arith.constant 0 : index
    %79 = vector.load %arg3[%c6, %c0_29] : memref<16x128xf32, #tpu.memory_space<vmem>>, vector<1x128xf32>
    %80 = vector.broadcast %79 : vector<1x128xf32> to vector<16x128xf32>
    %81 = arith.cmpf oge, %80, %4 : vector<16x128xf32>
    %cst_30 = arith.constant 1.000000e+00 : f32
    %cst_31 = arith.constant 0.000000e+00 : f32
    %82 = vector.broadcast %cst_30 : f32 to vector<16x128xf32>
    %83 = vector.broadcast %cst_31 : f32 to vector<16x128xf32>
    %84 = arith.select %81, %82, %83 : vector<16x128xi1>, vector<16x128xf32>
    %85 = arith.addf %73, %84 : vector<16x128xf32>
    %cst_32 = arith.constant 0.000000e+00 : f32
    %86 = vector.shape_cast %79 : vector<1x128xf32> to vector<1x128xf32>
    %87 = vector.broadcast %86 : vector<1x128xf32> to vector<16x128xf32>
    %88 = vector.broadcast %cst_32 : f32 to vector<16x128xf32>
    %89 = arith.select %81, %87, %88 : vector<16x128xi1>, vector<16x128xf32>
    %90 = arith.addf %78, %89 : vector<16x128xf32>
    %c7 = arith.constant 7 : index
    %c0_33 = arith.constant 0 : index
    %91 = vector.load %arg3[%c7, %c0_33] : memref<16x128xf32, #tpu.memory_space<vmem>>, vector<1x128xf32>
    %92 = vector.broadcast %91 : vector<1x128xf32> to vector<16x128xf32>
    %93 = arith.cmpf oge, %92, %4 : vector<16x128xf32>
    %cst_34 = arith.constant 1.000000e+00 : f32
    %cst_35 = arith.constant 0.000000e+00 : f32
    %94 = vector.broadcast %cst_34 : f32 to vector<16x128xf32>
    %95 = vector.broadcast %cst_35 : f32 to vector<16x128xf32>
    %96 = arith.select %93, %94, %95 : vector<16x128xi1>, vector<16x128xf32>
    %97 = arith.addf %85, %96 : vector<16x128xf32>
    %cst_36 = arith.constant 0.000000e+00 : f32
    %98 = vector.shape_cast %91 : vector<1x128xf32> to vector<1x128xf32>
    %99 = vector.broadcast %98 : vector<1x128xf32> to vector<16x128xf32>
    %100 = vector.broadcast %cst_36 : f32 to vector<16x128xf32>
    %101 = arith.select %93, %99, %100 : vector<16x128xi1>, vector<16x128xf32>
    %102 = arith.addf %90, %101 : vector<16x128xf32>
    %c8 = arith.constant 8 : index
    %c0_37 = arith.constant 0 : index
    %103 = vector.load %arg3[%c8, %c0_37] : memref<16x128xf32, #tpu.memory_space<vmem>>, vector<1x128xf32>
    %104 = vector.broadcast %103 : vector<1x128xf32> to vector<16x128xf32>
    %105 = arith.cmpf oge, %104, %4 : vector<16x128xf32>
    %cst_38 = arith.constant 1.000000e+00 : f32
    %cst_39 = arith.constant 0.000000e+00 : f32
    %106 = vector.broadcast %cst_38 : f32 to vector<16x128xf32>
    %107 = vector.broadcast %cst_39 : f32 to vector<16x128xf32>
    %108 = arith.select %105, %106, %107 : vector<16x128xi1>, vector<16x128xf32>
    %109 = arith.addf %97, %108 : vector<16x128xf32>
    %cst_40 = arith.constant 0.000000e+00 : f32
    %110 = vector.shape_cast %103 : vector<1x128xf32> to vector<1x128xf32>
    %111 = vector.broadcast %110 : vector<1x128xf32> to vector<16x128xf32>
    %112 = vector.broadcast %cst_40 : f32 to vector<16x128xf32>
    %113 = arith.select %105, %111, %112 : vector<16x128xi1>, vector<16x128xf32>
    %114 = arith.addf %102, %113 : vector<16x128xf32>
    %c9 = arith.constant 9 : index
    %c0_41 = arith.constant 0 : index
    %115 = vector.load %arg3[%c9, %c0_41] : memref<16x128xf32, #tpu.memory_space<vmem>>, vector<1x128xf32>
    %116 = vector.broadcast %115 : vector<1x128xf32> to vector<16x128xf32>
    %117 = arith.cmpf oge, %116, %4 : vector<16x128xf32>
    %cst_42 = arith.constant 1.000000e+00 : f32
    %cst_43 = arith.constant 0.000000e+00 : f32
    %118 = vector.broadcast %cst_42 : f32 to vector<16x128xf32>
    %119 = vector.broadcast %cst_43 : f32 to vector<16x128xf32>
    %120 = arith.select %117, %118, %119 : vector<16x128xi1>, vector<16x128xf32>
    %121 = arith.addf %109, %120 : vector<16x128xf32>
    %cst_44 = arith.constant 0.000000e+00 : f32
    %122 = vector.shape_cast %115 : vector<1x128xf32> to vector<1x128xf32>
    %123 = vector.broadcast %122 : vector<1x128xf32> to vector<16x128xf32>
    %124 = vector.broadcast %cst_44 : f32 to vector<16x128xf32>
    %125 = arith.select %117, %123, %124 : vector<16x128xi1>, vector<16x128xf32>
    %126 = arith.addf %114, %125 : vector<16x128xf32>
    %c10 = arith.constant 10 : index
    %c0_45 = arith.constant 0 : index
    %127 = vector.load %arg3[%c10, %c0_45] : memref<16x128xf32, #tpu.memory_space<vmem>>, vector<1x128xf32>
    %128 = vector.broadcast %127 : vector<1x128xf32> to vector<16x128xf32>
    %129 = arith.cmpf oge, %128, %4 : vector<16x128xf32>
    %cst_46 = arith.constant 1.000000e+00 : f32
    %cst_47 = arith.constant 0.000000e+00 : f32
    %130 = vector.broadcast %cst_46 : f32 to vector<16x128xf32>
    %131 = vector.broadcast %cst_47 : f32 to vector<16x128xf32>
    %132 = arith.select %129, %130, %131 : vector<16x128xi1>, vector<16x128xf32>
    %133 = arith.addf %121, %132 : vector<16x128xf32>
    %cst_48 = arith.constant 0.000000e+00 : f32
    %134 = vector.shape_cast %127 : vector<1x128xf32> to vector<1x128xf32>
    %135 = vector.broadcast %134 : vector<1x128xf32> to vector<16x128xf32>
    %136 = vector.broadcast %cst_48 : f32 to vector<16x128xf32>
    %137 = arith.select %129, %135, %136 : vector<16x128xi1>, vector<16x128xf32>
    %138 = arith.addf %126, %137 : vector<16x128xf32>
    %c11 = arith.constant 11 : index
    %c0_49 = arith.constant 0 : index
    %139 = vector.load %arg3[%c11, %c0_49] : memref<16x128xf32, #tpu.memory_space<vmem>>, vector<1x128xf32>
    %140 = vector.broadcast %139 : vector<1x128xf32> to vector<16x128xf32>
    %141 = arith.cmpf oge, %140, %4 : vector<16x128xf32>
    %cst_50 = arith.constant 1.000000e+00 : f32
    %cst_51 = arith.constant 0.000000e+00 : f32
    %142 = vector.broadcast %cst_50 : f32 to vector<16x128xf32>
    %143 = vector.broadcast %cst_51 : f32 to vector<16x128xf32>
    %144 = arith.select %141, %142, %143 : vector<16x128xi1>, vector<16x128xf32>
    %145 = arith.addf %133, %144 : vector<16x128xf32>
    %cst_52 = arith.constant 0.000000e+00 : f32
    %146 = vector.shape_cast %139 : vector<1x128xf32> to vector<1x128xf32>
    %147 = vector.broadcast %146 : vector<1x128xf32> to vector<16x128xf32>
    %148 = vector.broadcast %cst_52 : f32 to vector<16x128xf32>
    %149 = arith.select %141, %147, %148 : vector<16x128xi1>, vector<16x128xf32>
    %150 = arith.addf %138, %149 : vector<16x128xf32>
    %c12 = arith.constant 12 : index
    %c0_53 = arith.constant 0 : index
    %151 = vector.load %arg3[%c12, %c0_53] : memref<16x128xf32, #tpu.memory_space<vmem>>, vector<1x128xf32>
    %152 = vector.broadcast %151 : vector<1x128xf32> to vector<16x128xf32>
    %153 = arith.cmpf oge, %152, %4 : vector<16x128xf32>
    %cst_54 = arith.constant 1.000000e+00 : f32
    %cst_55 = arith.constant 0.000000e+00 : f32
    %154 = vector.broadcast %cst_54 : f32 to vector<16x128xf32>
    %155 = vector.broadcast %cst_55 : f32 to vector<16x128xf32>
    %156 = arith.select %153, %154, %155 : vector<16x128xi1>, vector<16x128xf32>
    %157 = arith.addf %145, %156 : vector<16x128xf32>
    %cst_56 = arith.constant 0.000000e+00 : f32
    %158 = vector.shape_cast %151 : vector<1x128xf32> to vector<1x128xf32>
    %159 = vector.broadcast %158 : vector<1x128xf32> to vector<16x128xf32>
    %160 = vector.broadcast %cst_56 : f32 to vector<16x128xf32>
    %161 = arith.select %153, %159, %160 : vector<16x128xi1>, vector<16x128xf32>
    %162 = arith.addf %150, %161 : vector<16x128xf32>
    %c13 = arith.constant 13 : index
    %c0_57 = arith.constant 0 : index
    %163 = vector.load %arg3[%c13, %c0_57] : memref<16x128xf32, #tpu.memory_space<vmem>>, vector<1x128xf32>
    %164 = vector.broadcast %163 : vector<1x128xf32> to vector<16x128xf32>
    %165 = arith.cmpf oge, %164, %4 : vector<16x128xf32>
    %cst_58 = arith.constant 1.000000e+00 : f32
    %cst_59 = arith.constant 0.000000e+00 : f32
    %166 = vector.broadcast %cst_58 : f32 to vector<16x128xf32>
    %167 = vector.broadcast %cst_59 : f32 to vector<16x128xf32>
    %168 = arith.select %165, %166, %167 : vector<16x128xi1>, vector<16x128xf32>
    %169 = arith.addf %157, %168 : vector<16x128xf32>
    %cst_60 = arith.constant 0.000000e+00 : f32
    %170 = vector.shape_cast %163 : vector<1x128xf32> to vector<1x128xf32>
    %171 = vector.broadcast %170 : vector<1x128xf32> to vector<16x128xf32>
    %172 = vector.broadcast %cst_60 : f32 to vector<16x128xf32>
    %173 = arith.select %165, %171, %172 : vector<16x128xi1>, vector<16x128xf32>
    %174 = arith.addf %162, %173 : vector<16x128xf32>
    %c14 = arith.constant 14 : index
    %c0_61 = arith.constant 0 : index
    %175 = vector.load %arg3[%c14, %c0_61] : memref<16x128xf32, #tpu.memory_space<vmem>>, vector<1x128xf32>
    %176 = vector.broadcast %175 : vector<1x128xf32> to vector<16x128xf32>
    %177 = arith.cmpf oge, %176, %4 : vector<16x128xf32>
    %cst_62 = arith.constant 1.000000e+00 : f32
    %cst_63 = arith.constant 0.000000e+00 : f32
    %178 = vector.broadcast %cst_62 : f32 to vector<16x128xf32>
    %179 = vector.broadcast %cst_63 : f32 to vector<16x128xf32>
    %180 = arith.select %177, %178, %179 : vector<16x128xi1>, vector<16x128xf32>
    %181 = arith.addf %169, %180 : vector<16x128xf32>
    %cst_64 = arith.constant 0.000000e+00 : f32
    %182 = vector.shape_cast %175 : vector<1x128xf32> to vector<1x128xf32>
    %183 = vector.broadcast %182 : vector<1x128xf32> to vector<16x128xf32>
    %184 = vector.broadcast %cst_64 : f32 to vector<16x128xf32>
    %185 = arith.select %177, %183, %184 : vector<16x128xi1>, vector<16x128xf32>
    %186 = arith.addf %174, %185 : vector<16x128xf32>
    %c15 = arith.constant 15 : index
    %c0_65 = arith.constant 0 : index
    %187 = vector.load %arg3[%c15, %c0_65] : memref<16x128xf32, #tpu.memory_space<vmem>>, vector<1x128xf32>
    %188 = vector.broadcast %187 : vector<1x128xf32> to vector<16x128xf32>
    %189 = arith.cmpf oge, %188, %4 : vector<16x128xf32>
    %cst_66 = arith.constant 1.000000e+00 : f32
    %cst_67 = arith.constant 0.000000e+00 : f32
    %190 = vector.broadcast %cst_66 : f32 to vector<16x128xf32>
    %191 = vector.broadcast %cst_67 : f32 to vector<16x128xf32>
    %192 = arith.select %189, %190, %191 : vector<16x128xi1>, vector<16x128xf32>
    %193 = arith.addf %181, %192 : vector<16x128xf32>
    %cst_68 = arith.constant 0.000000e+00 : f32
    %194 = vector.shape_cast %187 : vector<1x128xf32> to vector<1x128xf32>
    %195 = vector.broadcast %194 : vector<1x128xf32> to vector<16x128xf32>
    %196 = vector.broadcast %cst_68 : f32 to vector<16x128xf32>
    %197 = arith.select %189, %195, %196 : vector<16x128xi1>, vector<16x128xf32>
    %198 = arith.addf %186, %197 : vector<16x128xf32>
    %199 = arith.mulf %193, %4 : vector<16x128xf32>
    %cst_69 = arith.constant 1.000000e+00 : f32
    %200 = vector.broadcast %cst_69 : f32 to vector<16x128xf32>
    %201 = arith.addf %200, %199 : vector<16x128xf32>
    %202 = arith.cmpf ogt, %201, %198 : vector<16x128xf32>
    %cst_70 = arith.constant 0.000000e+00 : f32
    %203 = vector.broadcast %cst_70 : f32 to vector<16x128xf32>
    %204 = arith.select %202, %193, %203 : vector<16x128xi1>, vector<16x128xf32>
    %cst_71 = arith.constant dense<0xFF800000> : vector<128xf32>
    %205 = vector.multi_reduction <maximumf>, %204, %cst_71 [0] : vector<16x128xf32> to vector<128xf32>
    %206 = vector.shape_cast %205 : vector<128xf32> to vector<1x128xf32>
    %cst_72 = arith.constant 0.000000e+00 : f32
    %207 = vector.broadcast %cst_72 : f32 to vector<16x128xf32>
    %208 = arith.select %202, %4, %207 : vector<16x128xi1>, vector<16x128xf32>
    %cst_73 = arith.constant dense<0.000000e+00> : vector<128xf32>
    %209 = vector.multi_reduction <add>, %208, %cst_73 [0] : vector<16x128xf32> to vector<128xf32>
    %210 = vector.shape_cast %209 : vector<128xf32> to vector<1x128xf32>
    %cst_74 = arith.constant 1.000000e+00 : f32
    %211 = vector.broadcast %cst_74 : f32 to vector<1x128xf32>
    %212 = arith.subf %210, %211 : vector<1x128xf32>
    %213 = arith.divf %212, %206 : vector<1x128xf32>
    %214 = vector.broadcast %213 : vector<1x128xf32> to vector<16x128xf32>
    %215 = arith.subf %4, %214 : vector<16x128xf32>
    %cst_75 = arith.constant 0.000000e+00 : f32
    %216 = vector.broadcast %cst_75 : f32 to vector<16x128xf32>
    %217 = arith.maximumf %215, %216 : vector<16x128xf32>
    %c0_76 = arith.constant 0 : index
    %c0_77 = arith.constant 0 : index
    %218 = vector.load %arg2[%c0_76, %c0_77] : memref<16x128xf32, #tpu.memory_space<vmem>>, vector<16x128xf32>
    tpu.vector_store %arg2[%c0_76, %c0_77], %217 {strides = array<i32>} : memref<16x128xf32, #tpu.memory_space<vmem>>, vector<16x128xf32>,
    return
  }
  func.func @transform_0(%arg0: i32) -> (i32, i32) {
    %c0_i32 = arith.constant 0 : i32
    %c0_i32_0 = arith.constant 0 : i32
    return %c0_i32, %arg0 : i32, i32
  }
  func.func @transform_1(%arg0: i32) -> (i32, i32) {
    %c0_i32 = arith.constant 0 : i32
    %c0_i32_0 = arith.constant 0 : i32
    return %c0_i32, %arg0 : i32, i32
  }
}

</mosaic_0001>

<bundles_post_ra>
// kernel: tpu_custom_call.1
= control target key start
LH: loop header
LB: loop body
LE: loop exit
PB: predicated region body
PF: predicated region fallthrough
CT: control target
= control target key end

     0   :  { %6 = vsyncpa [#allocation4], 0  ;;  %s527_s0 = inlined_call_operand.hbm [shape: f32[16,128], index: 0, kind: input, shape index: {}]   ;;  %s528_s1 = inlined_call_operand.hbm [shape: f32[16,128], index: 1, kind: output, shape index: {}]  }
   0x1   :  { %7 = vsyncpa [#allocation5], 0  ;;  %s398_s6 = smov [#allocation3]   ;;  %s350_s10 = scalar_lea.hbm %s527_s0, 256 }
   0x2   :  { %s13_s7 = sshll.u32 %s398_s6, 4  ;;  %p351_p0 = scmp.ne.s32.totalorder %s527_s0, %s350_s10  ;;  %s14_s7 = int_to_ptr.vmem [resolvable:$true] %s13_s7 }
   0x3   :  { %p354_p1 = scmp.lt.u32.totalorder %s350_s10, %s527_s0 }
   0x5   :  { %p356_p2 = pnand %p354_p1, %p351_p0 }
   0x7   :  { %359 = shalt.err (!%p356_p2)
}
   0x8   :  { %s360_s15 = scalar_lea.vmem %s14_s7, 256  ;;  %p365_p4 = scmp.lt.s32.totalorder %s14_s7, %s14_s7 }
   0x9   :  { %p361_p3 = scmp.ne.s32.totalorder %s14_s7, %s360_s15  ;;  %p366_p5 = scmp.lt.s32.totalorder %s360_s15, %s360_s15 }
   0xb   :  { %p367_p6 = por %p366_p5, %p365_p4 }
   0xd   :  { %p368_p7 = pnand %p367_p6, %p361_p3 }
   0xf   :  { %371 = shalt.err (!%p368_p7)
}
  0x10   :  { %s399_s16 = smov 128   ;;  %s400_s17 = smov 8  }
  0x11   :  { %19 = dma.hbm_to_vmem [thread:$0]  %s527_s0, 256, %s14_s7, [#allocation4], %s399_s16, %s399_s16, %s400_s17  }
  0x12   :  { %394 = dma.done.wait [#allocation4], 256  }
  0x13   :  { %395 = vsyncadd [#allocation4], 4294967040  ;;  %v23_v0 = vld [vmem:[#allocation3] sm:$0xff]  ;;  %v24_v1 = vld [vmem:[#allocation3 + $0x8] sm:$0xff]  ;;  %v401_v14 = vmov 0.0   ;;  %s402_s0 = smov [#allocation6]  }
  0x14   :  { %v25_v2 = vmax.f32 %v23_v0, %v24_v1  ;;  %s314_s20 = sshll.u32 %s402_s0, 4  ;;  %s315_s20 = int_to_ptr.vmem [resolvable:$true] %s314_s20 }
  0x15   :  { %s372_s21 = scalar_lea.vmem %s315_s20, 256  ;;  %p377_p9 = scmp.lt.s32.totalorder %s315_s20, %s315_s20 }
  0x16   :  { %v26_v3 = vrot.slane %v25_v2, 4  ;;  %p373_p8 = scmp.ne.s32.totalorder %s315_s20, %s372_s21  ;;  %p378_p10 = scmp.lt.s32.totalorder %s372_s21, %s372_s21 }
  0x18   :  { %v27_v4 = vmax.f32 %v25_v2, %v26_v3  ;;  %p379_p11 = por %p378_p10, %p377_p9 }
  0x1a   :  { %v28_v5 = vrot.slane %v27_v4, 2  ;;  %p380_p12 = pnand %p379_p11, %p373_p8 }
  0x1c   :  { %v29_v6 = vmax.f32 %v27_v4, %v28_v5 }
  0x1e   :  { %v30_v7 = vrot.slane %v29_v6, 1 }
  0x20   :  { %v31_v8 = vmax.f32 %v29_v6, %v30_v7 }
  0x22   :  { %v428_v9 = vsub.f32 %v23_v0, %v31_v8  ;;  %v430_v10 = vsub.f32 %v24_v1, %v31_v8 }
  0x24   :  { %34 = vst [vmem:[#allocation2] sm:$0xff] %v428_v9  ;;  %35 = vst [vmem:[#allocation2 + $0x8] sm:$0xff] %v430_v10 }
  0x2b   :  { %v326_v11 = vld [vmem:[#allocation2] ss:$0 sm:$0xff]  ;;  %v327_v12 = vld [vmem:[#allocation2 + $0x1] ss:$0 sm:$0xff]  ;;  %v328_v13 = vld [vmem:[#allocation2 + $0x2] ss:$0 sm:$0xff] }
  0x2c   :  { %vm41_vm0 = vcmp.ge.f32.partialorder %v326_v11, %v428_v9  ;;  %vm42_vm1 = vcmp.ge.f32.partialorder %v326_v11, %v430_v10  ;;  %vm56_vm2 = vcmp.ge.f32.partialorder %v327_v12, %v428_v9  ;;  %vm57_vm3 = vcmp.ge.f32.partialorder %v327_v12, %v430_v10  ;;  %v329_v19 = vld [vmem:[#allocation2 + $0x3] ss:$0 sm:$0xff]  ;;  %v330_v36 = vld [vmem:[#allocation2 + $0x4] ss:$0 sm:$0xff]  ;;  %v331_v37 = vld [vmem:[#allocation2 + $0x5] ss:$0 sm:$0xff] }
  0x2d   :  { %v43_v15 = vsel %vm41_vm0, 1.0, %v401_v14  ;;  %v44_v16 = vsel %vm42_vm1, 1.0, %v401_v14  ;;  %v47_v17 = vsel %vm41_vm0, %v326_v11, 0.0  ;;  %v48_v18 = vsel %vm42_vm1, %v326_v11, 0.0  ;;  %v332_v50 = vld [vmem:[#allocation2 + $0x6] ss:$0 sm:$0xff] }
  0x2e   :  { %v58_v20 = vsel %vm56_vm2, 1.0, %v401_v14  ;;  %v59_v21 = vsel %vm57_vm3, 1.0, %v401_v14  ;;  %v62_v22 = vsel %vm56_vm2, %v327_v12, 0.0  ;;  %v63_v23 = vsel %vm57_vm3, %v327_v12, 0.0  ;;  %v333_v59 = vld [vmem:[#allocation2 + $0x7] ss:$0 sm:$0xff] }
  0x2f   :  { %v60_v24 = vadd.f32 %v58_v20, %v43_v15  ;;  %v61_v25 = vadd.f32 %v59_v21, %v44_v16  ;;  %v64_v26 = vadd.f32 %v62_v22, %v47_v17  ;;  %v65_v27 = vadd.f32 %v63_v23, %v48_v18  ;;  %v334_v6 = vld [vmem:[#allocation2 + $0x8] ss:$0 sm:$0xff]  ;;  %v335_v7 = vld [vmem:[#allocation2 + $0x9] ss:$0 sm:$0xff] }
  0x30   :  { %vm71_vm4 = vcmp.ge.f32.partialorder %v328_v13, %v428_v9  ;;  %vm72_vm5 = vcmp.ge.f32.partialorder %v328_v13, %v430_v10  ;;  %vm86_vm6 = vcmp.ge.f32.partialorder %v329_v19, %v428_v9  ;;  %vm87_vm7 = vcmp.ge.f32.partialorder %v329_v19, %v430_v10 }
  0x31   :  { %v73_v28 = vsel %vm71_vm4, 1.0, %v401_v14  ;;  %v74_v29 = vsel %vm72_vm5, 1.0, %v401_v14  ;;  %v77_v30 = vsel %vm71_vm4, %v328_v13, 0.0  ;;  %v78_v31 = vsel %vm72_vm5, %v328_v13, 0.0 }
  0x32   :  { %v75_v32 = vadd.f32 %v73_v28, %v60_v24  ;;  %v76_v33 = vadd.f32 %v74_v29, %v61_v25  ;;  %v79_v34 = vadd.f32 %v77_v30, %v64_v26  ;;  %v80_v35 = vadd.f32 %v78_v31, %v65_v27  ;;  %v336_v29 = vld [vmem:[#allocation2 + $0xa] ss:$0 sm:$0xff]  ;;  %v337_v30 = vld [vmem:[#allocation2 + $0xb] ss:$0 sm:$0xff] }
  0x33   :  { %v88_v38 = vsel %vm86_vm6, 1.0, %v401_v14  ;;  %v89_v39 = vsel %vm87_vm7, 1.0, %v401_v14  ;;  %v92_v40 = vsel %vm86_vm6, %v329_v19, 0.0  ;;  %v93_v41 = vsel %vm87_vm7, %v329_v19, 0.0 }
  0x34   :  { %v90_v42 = vadd.f32 %v88_v38, %v75_v32  ;;  %v91_v43 = vadd.f32 %v89_v39, %v76_v33  ;;  %v94_v44 = vadd.f32 %v92_v40, %v79_v34  ;;  %v95_v45 = vadd.f32 %v93_v41, %v80_v35 }
  0x35   :  { %vm101_vm8 = vcmp.ge.f32.partialorder %v330_v36, %v428_v9  ;;  %vm102_vm9 = vcmp.ge.f32.partialorder %v330_v36, %v430_v10  ;;  %vm116_vm10 = vcmp.ge.f32.partialorder %v331_v37, %v428_v9  ;;  %vm117_vm11 = vcmp.ge.f32.partialorder %v331_v37, %v430_v10 }
  0x36   :  { %v103_v46 = vsel %vm101_vm8, 1.0, %v401_v14  ;;  %v104_v47 = vsel %vm102_vm9, 1.0, %v401_v14  ;;  %v107_v48 = vsel %vm101_vm8, %v330_v36, 0.0  ;;  %v108_v49 = vsel %vm102_vm9, %v330_v36, 0.0 }
  0x37   :  { %v105_v51 = vadd.f32 %v103_v46, %v90_v42  ;;  %v106_v52 = vadd.f32 %v104_v47, %v91_v43  ;;  %v109_v53 = vadd.f32 %v107_v48, %v94_v44  ;;  %v110_v54 = vadd.f32 %v108_v49, %v95_v45  ;;  %v338_v47 = vld [vmem:[#allocation2 + $0xc] ss:$0 sm:$0xff]  ;;  %v339_v48 = vld [vmem:[#allocation2 + $0xd] ss:$0 sm:$0xff] }
  0x38   :  { %v118_v55 = vsel %vm116_vm10, 1.0, %v401_v14  ;;  %v119_v56 = vsel %vm117_vm11, 1.0, %v401_v14  ;;  %v122_v57 = vsel %vm116_vm10, %v331_v37, 0.0  ;;  %v123_v58 = vsel %vm117_vm11, %v331_v37, 0.0 }
  0x39   :  { %vm131_vm12 = vcmp.ge.f32.partialorder %v332_v50, %v428_v9  ;;  %vm132_vm13 = vcmp.ge.f32.partialorder %v332_v50, %v430_v10  ;;  %v120_v60 = vadd.f32 %v118_v55, %v105_v51  ;;  %v121_v61 = vadd.f32 %v119_v56, %v106_v52 }
  0x3a   :  { %v124_v62 = vadd.f32 %v122_v57, %v109_v53  ;;  %v125_v63 = vadd.f32 %v123_v58, %v110_v54  ;;  %v133_v0 = vsel %vm131_vm12, 1.0, %v401_v14  ;;  %v134_v1 = vsel %vm132_vm13, 1.0, %v401_v14 }
  0x3b   :  { %v135_v2 = vadd.f32 %v133_v0, %v120_v60  ;;  %v136_v3 = vadd.f32 %v134_v1, %v121_v61  ;;  %v137_v4 = vsel %vm131_vm12, %v332_v50, 0.0  ;;  %v138_v5 = vsel %vm132_vm13, %v332_v50, 0.0  ;;  %v340_v1 = vld [vmem:[#allocation2 + $0xe] ss:$0 sm:$0xff] }
  0x3c   :  { %v139_v8 = vadd.f32 %v137_v4, %v124_v62  ;;  %v140_v11 = vadd.f32 %v138_v5, %v125_v63  ;;  %vm146_vm14 = vcmp.ge.f32.partialorder %v333_v59, %v428_v9  ;;  %vm147_vm15 = vcmp.ge.f32.partialorder %v333_v59, %v430_v10 }
  0x3d   :  { %v148_v12 = vsel %vm146_vm14, 1.0, %v401_v14  ;;  %v149_v13 = vsel %vm147_vm15, 1.0, %v401_v14  ;;  %v152_v15 = vsel %vm146_vm14, %v333_v59, 0.0  ;;  %v153_v16 = vsel %vm147_vm15, %v333_v59, 0.0 }
  0x3e   :  { %v150_v17 = vadd.f32 %v148_v12, %v135_v2  ;;  %v151_v18 = vadd.f32 %v149_v13, %v136_v3  ;;  %v154_v19 = vadd.f32 %v152_v15, %v139_v8  ;;  %v155_v20 = vadd.f32 %v153_v16, %v140_v11  ;;  %v341_v2 = vld [vmem:[#allocation2 + $0xf] ss:$0 sm:$0xff] }
  0x3f   :  { %vm161_vm0 = vcmp.ge.f32.partialorder %v334_v6, %v428_v9  ;;  %vm162_vm1 = vcmp.ge.f32.partialorder %v334_v6, %v430_v10  ;;  %vm176_vm2 = vcmp.ge.f32.partialorder %v335_v7, %v428_v9  ;;  %vm177_vm3 = vcmp.ge.f32.partialorder %v335_v7, %v430_v10 }
  0x40   :  { %v163_v21 = vsel %vm161_vm0, 1.0, %v401_v14  ;;  %v164_v22 = vsel %vm162_vm1, 1.0, %v401_v14  ;;  %v167_v23 = vsel %vm161_vm0, %v334_v6, 0.0  ;;  %v168_v24 = vsel %vm162_vm1, %v334_v6, 0.0 }
  0x41   :  { %v165_v25 = vadd.f32 %v163_v21, %v150_v17  ;;  %v166_v26 = vadd.f32 %v164_v22, %v151_v18  ;;  %v169_v27 = vadd.f32 %v167_v23, %v154_v19  ;;  %v170_v28 = vadd.f32 %v168_v24, %v155_v20 }
  0x42   :  { %v178_v31 = vsel %vm176_vm2, 1.0, %v401_v14  ;;  %v179_v32 = vsel %vm177_vm3, 1.0, %v401_v14  ;;  %v182_v33 = vsel %vm176_vm2, %v335_v7, 0.0  ;;  %v183_v34 = vsel %vm177_vm3, %v335_v7, 0.0 }
  0x43   :  { %v180_v35 = vadd.f32 %v178_v31, %v165_v25  ;;  %v181_v36 = vadd.f32 %v179_v32, %v166_v26  ;;  %v184_v37 = vadd.f32 %v182_v33, %v169_v27  ;;  %v185_v38 = vadd.f32 %v183_v34, %v170_v28 }
  0x44   :  { %vm191_vm4 = vcmp.ge.f32.partialorder %v336_v29, %v428_v9  ;;  %vm192_vm5 = vcmp.ge.f32.partialorder %v336_v29, %v430_v10  ;;  %vm206_vm6 = vcmp.ge.f32.partialorder %v337_v30, %v428_v9  ;;  %vm207_vm7 = vcmp.ge.f32.partialorder %v337_v30, %v430_v10 }
  0x45   :  { %v193_v39 = vsel %vm191_vm4, 1.0, %v401_v14  ;;  %v194_v40 = vsel %vm192_vm5, 1.0, %v401_v14  ;;  %v197_v41 = vsel %vm191_vm4, %v336_v29, 0.0  ;;  %v198_v42 = vsel %vm192_vm5, %v336_v29, 0.0 }
  0x46   :  { %v195_v43 = vadd.f32 %v193_v39, %v180_v35  ;;  %v196_v44 = vadd.f32 %v194_v40, %v181_v36  ;;  %v199_v45 = vadd.f32 %v197_v41, %v184_v37  ;;  %v200_v46 = vadd.f32 %v198_v42, %v185_v38 }
  0x47   :  { %v208_v49 = vsel %vm206_vm6, 1.0, %v401_v14  ;;  %v209_v50 = vsel %vm207_vm7, 1.0, %v401_v14  ;;  %v212_v51 = vsel %vm206_vm6, %v337_v30, 0.0  ;;  %v213_v52 = vsel %vm207_vm7, %v337_v30, 0.0 }
  0x48   :  { %v210_v53 = vadd.f32 %v208_v49, %v195_v43  ;;  %v211_v54 = vadd.f32 %v209_v50, %v196_v44  ;;  %v214_v55 = vadd.f32 %v212_v51, %v199_v45  ;;  %v215_v56 = vadd.f32 %v213_v52, %v200_v46 }
  0x49   :  { %vm221_vm8 = vcmp.ge.f32.partialorder %v338_v47, %v428_v9  ;;  %vm222_vm9 = vcmp.ge.f32.partialorder %v338_v47, %v430_v10  ;;  %vm236_vm10 = vcmp.ge.f32.partialorder %v339_v48, %v428_v9  ;;  %vm237_vm11 = vcmp.ge.f32.partialorder %v339_v48, %v430_v10 }
  0x4a   :  { %v223_v57 = vsel %vm221_vm8, 1.0, %v401_v14  ;;  %v224_v58 = vsel %vm222_vm9, 1.0, %v401_v14  ;;  %v227_v59 = vsel %vm221_vm8, %v338_v47, 0.0  ;;  %v228_v60 = vsel %vm222_vm9, %v338_v47, 0.0 }
  0x4b   :  { %v225_v61 = vadd.f32 %v223_v57, %v210_v53  ;;  %v226_v62 = vadd.f32 %v224_v58, %v211_v54  ;;  %v229_v63 = vadd.f32 %v227_v59, %v214_v55  ;;  %v230_v0 = vadd.f32 %v228_v60, %v215_v56 }
  0x4c   :  { %v238_v3 = vsel %vm236_vm10, 1.0, %v401_v14  ;;  %v239_v4 = vsel %vm237_vm11, 1.0, %v401_v14  ;;  %v242_v5 = vsel %vm236_vm10, %v339_v48, 0.0  ;;  %v243_v6 = vsel %vm237_vm11, %v339_v48, 0.0 }
  0x4d   :  { %v240_v7 = vadd.f32 %v238_v3, %v225_v61  ;;  %v241_v8 = vadd.f32 %v239_v4, %v226_v62  ;;  %v244_v11 = vadd.f32 %v242_v5, %v229_v63  ;;  %v245_v12 = vadd.f32 %v243_v6, %v230_v0 }
  0x4e   :  { %vm251_vm12 = vcmp.ge.f32.partialorder %v340_v1, %v428_v9  ;;  %vm252_vm13 = vcmp.ge.f32.partialorder %v340_v1, %v430_v10  ;;  %vm266_vm14 = vcmp.ge.f32.partialorder %v341_v2, %v428_v9  ;;  %vm267_vm15 = vcmp.ge.f32.partialorder %v341_v2, %v430_v10 }
  0x4f   :  { %v253_v13 = vsel %vm251_vm12, 1.0, %v401_v14  ;;  %v254_v15 = vsel %vm252_vm13, 1.0, %v401_v14  ;;  %v257_v18 = vsel %vm251_vm12, %v340_v1, 0.0  ;;  %v258_v19 = vsel %vm252_vm13, %v340_v1, 0.0 }
  0x50   :  { %v255_v16 = vadd.f32 %v253_v13, %v240_v7  ;;  %v256_v17 = vadd.f32 %v254_v15, %v241_v8  ;;  %v268_v20 = vsel %vm266_vm14, 1.0, %v401_v14  ;;  %v269_v21 = vsel %vm267_vm15, 1.0, %v401_v14 }
  0x51   :  { %v259_v22 = vadd.f32 %v257_v18, %v244_v11  ;;  %v260_v23 = vadd.f32 %v258_v19, %v245_v12  ;;  %v272_v28 = vsel %vm266_vm14, %v341_v2, 0.0  ;;  %v273_v29 = vsel %vm267_vm15, %v341_v2, 0.0 }
  0x52   :  { %v270_v24 = vadd.f32 %v268_v20, %v255_v16  ;;  %v271_v25 = vadd.f32 %v269_v21, %v256_v17 }
  0x53   :  { %v274_v30 = vadd.f32 %v272_v28, %v259_v22  ;;  %v275_v31 = vadd.f32 %v273_v29, %v260_v23 }
  0x54   :  { %v276_v26 = vmul.f32 %v270_v24, %v428_v9  ;;  %v277_v27 = vmul.f32 %v271_v25, %v430_v10 }
  0x56   :  { %v278_v32 = vadd.f32 1.0, %v276_v26  ;;  %v279_v33 = vadd.f32 1.0, %v277_v27 }
  0x58   :  { %vm280_vm0 = vcmp.gt.f32.partialorder %v278_v32, %v274_v30  ;;  %vm281_vm1 = vcmp.gt.f32.partialorder %v279_v33, %v275_v31 }
  0x59   :  { %v282_v14 = vsel %vm280_vm0, %v270_v24, 0.0  ;;  %v283_v34 = vsel %vm281_vm1, %v271_v25, 0.0  ;;  %v291_v35 = vsel %vm280_vm0, %v428_v9, 0.0  ;;  %v292_v36 = vsel %vm281_vm1, %v430_v10, 0.0 }
  0x5a   :  { %v284_v37 = vmax.f32 %v282_v14, %v283_v34  ;;  %v293_v38 = vadd.f32 %v292_v36, %v291_v35 }
  0x5c   :  { %v285_v39 = vrot.slane %v284_v37, 4  ;;  %v294_v40 = vrot.slane %v293_v38, 4 }
  0x5e   :  { %v286_v41 = vmax.f32 %v284_v37, %v285_v39  ;;  %v295_v42 = vadd.f32 %v294_v40, %v293_v38 }
  0x60   :  { %v287_v43 = vrot.slane %v286_v41, 2  ;;  %v296_v44 = vrot.slane %v295_v42, 2 }
  0x62   :  { %v288_v45 = vmax.f32 %v286_v41, %v287_v43  ;;  %v297_v47 = vadd.f32 %v296_v44, %v295_v42 }
  0x64   :  { %v289_v46 = vrot.slane %v288_v45, 1  ;;  %v298_v49 = vrot.slane %v297_v47, 1 }
  0x66   :  { %v290_v48 = vmax.f32 %v288_v45, %v289_v46  ;;  %v299_v50 = vadd.f32 %v298_v49, %v297_v47 }
  0x68   :  { %348 = vrcp.f32 %v290_v48  ;;  %v342_v51 = vadd.f32 -1.0, %v299_v50 }
  0x72   :  { %v349_v52 = vpop.eup %348 }
  0x73   :  { %v302_v53 = vmul.f32 %v349_v52, %v342_v51 }
  0x75   :  { %v303_v54 = vsub.f32 %v428_v9, %v302_v53  ;;  %v304_v55 = vsub.f32 %v430_v10, %v302_v53 }
  0x77   :  { %v305_v56 = vmax.f32 %v303_v54, 0.0  ;;  %v306_v57 = vmax.f32 %v304_v55, 0.0 }
  0x79   :  { %307 = vst [vmem:[#allocation6] sm:$0xff] %v305_v56  ;;  %308 = vst [vmem:[#allocation6 + $0x8] sm:$0xff] %v306_v57 }
  0x7a   :  { %383 = shalt.err (!%p380_p12)
}
  0x7b   :  { %s384_s24 = scalar_lea.hbm %s528_s1, 256 }
  0x7c   :  { %p385_p13 = scmp.ne.s32.totalorder %s528_s1, %s384_s24  ;;  %p388_p0 = scmp.lt.u32.totalorder %s384_s24, %s528_s1 }
  0x7e   :  { %p390_p1 = pnand %p388_p0, %p385_p13 }
  0x80   :  { %393 = shalt.err (!%p390_p1)
}
  0x81   :  { %320 = dma.vmem_to_hbm [thread:$0]  %s315_s20, 256, %s528_s1, [#allocation5], %s399_s16, %s399_s16, %s400_s17  }
  0x82   :  { %396 = dma.done.wait [#allocation5], 256  }
  0x83   :  { %397 = vsyncadd [#allocation5], 4294967040 }
  0x84   :  { %324 = vsyncpa [#allocation4], 1 }
  0x85   :  { %325 = vsyncpa [#allocation5], 1 }

</bundles_post_ra>
